<compile_context>
chip_gen: v5e
topology: v5e:2x2
jax: 0.10.0
libtpu: 0.0.40
codegen_flags: <defaults>
</compile_context>

<pallas_src>
import jax
import jax.numpy as jnp
from jax.experimental import pallas as pl
from jax.experimental.pallas import tpu as pltpu

EPS = 1e-5        # BatchNorm2d default eps
N_CORES = 2       # leading "parallel" grid axis (v7x megacore); fine on 1-TC chips
LANE = 128
SUBLANE = 8


def _round_up(x, m):
    return (x + m - 1) // m * m


# ---------------------------------------------------------------- kernels ---
def _make_layer_kernel(fuse_bn, want_stats, mask_rows, m_true, tm, tiles_per_core):
    """Build one fused layer kernel.

    refs: h, [scale, shift,] w(bf16), b  ->  y, [s, ss]
      fuse_bn:    a = relu(h * scale + shift)   (f32 epilogue), else a = h
      matmul:     y = a(bf16) @ w(bf16) + b     (f32 MXU accumulation)
      want_stats: accumulate per-channel sum / sum-of-squares of y
                  (per-core partials, resident across the inner grid axis)
    """

    def kernel(*refs):
        if fuse_bn:
            h_ref, sc_ref, sh_ref, w_ref, b_ref = refs[:5]
            out_refs = refs[5:]
        else:
            h_ref, w_ref, b_ref = refs[:3]
            out_refs = refs[3:]
        if want_stats:
            y_ref, s_ref, ss_ref = out_refs
        else:
            (y_ref,) = out_refs

        i = pl.program_id(1)

        if want_stats:
            @pl.when(i == 0)
            def _():
                s_ref[...] = jnp.zeros_like(s_ref)
                ss_ref[...] = jnp.zeros_like(ss_ref)

        a = h_ref[...]
        if fuse_bn:
            # folded BN + ReLU kept in f32 (v5e VPU has no bf16 ALU path)
            a = jnp.maximum(a * sc_ref[...] + sh_ref[...], 0.0)

        y = jnp.dot(a.astype(jnp.bfloat16), w_ref[...],
                    preferred_element_type=jnp.float32)
        y = y + b_ref[...]

        if mask_rows:
            # zero rows that only exist because M was padded up to a multiple
            # of N_CORES * tm -> keeps batch statistics exact
            c = pl.program_id(0)
            base = (c * tiles_per_core + i) * tm
            row = base + jax.lax.broadcasted_iota(jnp.int32, (tm, 1), 0)
            y = jnp.where(row < m_true, y, 0.0)

        y_ref[...] = y.astype(y_ref.dtype)

        if want_stats:
            s_ref[...] += jnp.sum(y, axis=0, keepdims=True)
            ss_ref[...] += jnp.sum(y * y, axis=0, keepdims=True)

    return kernel


# ------------------------------------------------------------- call glue ---
def _layer_call(h, w_bf16, b, scale=None, shift=None, *, want_stats, m_true, tm):
    """One fused layer: optional (BN-fold + ReLU) -> matmul -> bias -> stats."""
    m_pad, kp = h.shape
    hp = w_bf16.shape[1]
    tpc = m_pad // (N_CORES * tm)             # row tiles per core
    fuse_bn = scale is not None
    mask_rows = (m_pad != m_true)

    row_in = pl.BlockSpec((tm, kp), lambda c, i: (c * tpc + i, 0))
    chan_k = pl.BlockSpec((1, kp), lambda c, i: (0, 0))
    w_spec = pl.BlockSpec((kp, hp), lambda c, i: (0, 0))
    b_spec = pl.BlockSpec((1, hp), lambda c, i: (0, 0))
    row_out = pl.BlockSpec((tm, hp), lambda c, i: (c * tpc + i, 0))
    stat_spec = pl.BlockSpec((None, 1, hp), lambda c, i: (c, 0, 0))

    in_specs = [row_in]
    args = [h]
    if fuse_bn:
        in_specs += [chan_k, chan_k]
        args += [scale, shift]
    in_specs += [w_spec, b_spec]
    args += [w_bf16, b]

    if want_stats:
        out_shape = (jax.ShapeDtypeStruct((m_pad, hp), jnp.float32),
                     jax.ShapeDtypeStruct((N_CORES, 1, hp), jnp.float32),
                     jax.ShapeDtypeStruct((N_CORES, 1, hp), jnp.float32))
        out_specs = (row_out, stat_spec, stat_spec)
        dim_sem = ("parallel", "arbitrary")   # stats = resident accumulators
    else:
        out_shape = jax.ShapeDtypeStruct((m_pad, hp), jnp.float32)
        out_specs = row_out
        dim_sem = ("parallel", "parallel")

    kernel = _make_layer_kernel(fuse_bn, want_stats, mask_rows, m_true, tm, tpc)

    return pl.pallas_call(
        kernel,
        out_shape=out_shape,
        grid_spec=pltpu.PrefetchScalarGridSpec(
            num_scalar_prefetch=0,
            grid=(N_CORES, tpc),
            in_specs=in_specs,
            out_specs=out_specs),
        compiler_params=pltpu.CompilerParams(
            dimension_semantics=dim_sem,
            vmem_limit_bytes=48 * 1024 * 1024),
    )(*args)


def _pick_tm(m, max_feat_p):
    """Largest row tile (<=512, x8) fitting a conservative (v7x-safe) VMEM budget."""
    budget = 40 * 1024 * 1024
    w_bytes = max_feat_p * max_feat_p * 2            # resident bf16 weight
    per_row = 8 * (max_feat_p + max_feat_p)          # dbl-buffered f32 in + out row
    avail = max(budget - w_bytes, per_row * SUBLANE)
    cap = max(SUBLANE, (avail // per_row) // SUBLANE * SUBLANE)
    want = _round_up(-(-m // N_CORES), SUBLANE)      # ceil(m / N_CORES) -> x8
    return min(512, cap, want)


def _pad_wb(w, b):
    k, h = w.shape
    kp, hp = _round_up(k, LANE), _round_up(h, LANE)
    w_p = jnp.pad(w, ((0, kp - k), (0, hp - h))).astype(jnp.bfloat16)
    b_p = jnp.pad(b.reshape(1, -1), ((0, 0), (0, hp - h))).astype(jnp.float32)
    return w_p, b_p


def mlp_forward(x, params, num_layers):
    """x: (N, D1, D2, input_dim) float32 -> (N, D1, D2, output_dim)."""
    n, d1, d2, cin = x.shape
    m = n * d1 * d2
    linears = params["linears"]
    out_dim = linears[-1][0].shape[1]

    # choose row tile & pad everything to TPU-friendly (lane-dense) shapes
    feat_dims = [cin] + [w.shape[1] for w, _ in linears]
    max_feat_p = max(_round_up(d, LANE) for d in feat_dims)
    tm = _pick_tm(m, max_feat_p)
    m_pad = _round_up(m, N_CORES * tm)
    cin_p = _round_up(cin, LANE)

    h = x.reshape(m, cin).astype(jnp.float32)
    h = jnp.pad(h, ((0, m_pad - m), (0, cin_p - cin)))

    # --- layer 0: plain linear (collect batch stats of its output) ---------
    w0, b0 = _pad_wb(*linears[0])
    if num_layers == 1:
        y = _layer_call(h, w0, b0, want_stats=False, m_true=m, tm=tm)
        return y[:m, :out_dim].reshape(n, d1, d2, out_dim)

    h, s, ss = _layer_call(h, w0, b0, want_stats=True, m_true=m, tm=tm)

    # --- layers 1..L-1: fold training-mode BN (+ReLU) into the next matmul --
    for i in range(1, num_layers):
        gamma, beta = params["bns"][i - 1]              # (1, hidden)
        hidden = gamma.shape[1]
        hidden_p = _round_up(hidden, LANE)
        gamma_p = jnp.pad(gamma, ((0, 0), (0, hidden_p - hidden)))
        beta_p = jnp.pad(beta, ((0, 0), (0, hidden_p - hidden)))

        s_tot = jnp.sum(s, axis=0)                      # reduce per-core partials
        ss_tot = jnp.sum(ss, axis=0)
        mean = s_tot / m
        var = jnp.maximum(ss_tot / m - mean * mean, 0.0)  # biased var, clamped
        scale = gamma_p * jax.lax.rsqrt(var + EPS)
        shift = beta_p - mean * scale

        w, b = _pad_wb(*linears[i])
        if i == num_layers - 1:                         # stats-free last layer
            h = _layer_call(h, w, b, scale, shift,
                            want_stats=False, m_true=m, tm=tm)
        else:
            h, s, ss = _layer_call(h, w, b, scale, shift,
                                   want_stats=True, m_true=m, tm=tm)

    return h[:m, :out_dim].reshape(n, d1, d2, out_dim)


# -------------------------------------------------------------- reference ---
def mlp_ref(x, params, num_layers):
    h = x.astype(jnp.float32)
    if num_layers == 1:
        w, b = params["linears"][0]
        return h @ w + b.reshape(-1)
    for i in range(num_layers - 1):
        w, b = params["linears"][i]
        h = h @ w + b.reshape(-1)
        gamma, beta = params["bns"][i]
        mean = h.mean(axis=(0, 1, 2))
        var = ((h - mean) ** 2).mean(axis=(0, 1, 2))
        h = jnp.maximum(gamma.reshape(-1) * (h - mean) / jnp.sqrt(var + EPS)
                        + beta.reshape(-1), 0.0)
    w, b = params["linears"][-1]
    return h @ w + b.reshape(-1)


# ------------------------------------------------------------------- main ---
if __name__ == "__main__":
    num_layers, input_dim, hidden_dim, output_dim = 3, 16, 32, 8
    N, D1, D2 = 2, 4, 4

    key = jax.random.PRNGKey(0)
    keys = jax.random.split(key, 2 * num_layers + 1)

    dims = [input_dim] + [hidden_dim] * (num_layers - 1) + [output_dim]
    linears = []
    for i in range(num_layers):
        w = 0.1 * jax.random.normal(keys[2 * i], (dims[i], dims[i + 1]), jnp.float32)
        b = 0.1 * jax.random.normal(keys[2 * i + 1], (1, dims[i + 1]), jnp.float32)
        linears.append((w, b))
    # BatchNorm2d default affine params: weight=1, bias=0
    bns = [(jnp.ones((1, hidden_dim), jnp.float32),
            jnp.zeros((1, hidden_dim), jnp.float32))
           for _ in range(num_layers - 1)]
    params = {"linears": linears, "bns": bns}

    x = jax.random.normal(keys[-1], (N, D1, D2, input_dim), jnp.float32)

    out = jax.block_until_ready(mlp_forward(x, params, num_layers))
    ref = mlp_ref(x, params, num_layers)

    assert out.shape == (N, D1, D2, output_dim)
    # tolerance covers bf16 MXU operands (accumulation and BN math stay f32)
    assert jnp.allclose(out, ref, atol=5e-2, rtol=5e-2), (
        "mismatch vs reference, max abs err="
        f"{float(jnp.max(jnp.abs(out - ref)))}")

    print("KERNEL_OK")
</pallas_src>

<mosaic_0001>
module attributes {stable_mosaic.version = 11 : i64} {
  func.func @kernel(%arg0: i32, %arg1: i32, %arg2: memref<16x128xf32, #tpu.memory_space<vmem>>, %arg3: memref<128x128xbf16, #tpu.memory_space<vmem>>, %arg4: memref<1x128xf32, #tpu.memory_space<vmem>>, %arg5: memref<16x128xf32, #tpu.memory_space<vmem>>, %arg6: memref<1x1x128xf32, #tpu.memory_space<vmem>>, %arg7: memref<1x1x128xf32, #tpu.memory_space<vmem>>) attributes {dimension_semantics = [#tpu.dimension_semantics<parallel>, #tpu.dimension_semantics<arbitrary>], iteration_bounds = array<i64: 2, 1>, scalar_prefetch = 0 : i64, scratch_operands = 0 : i64, tpu.core_type = #tpu.core_type<tc>, window_params = [{transform_indices = @transform_0, window_bounds = array<i64: 16, 128>}, {pipeline_mode = #tpu.pipeline_mode<synchronous>, transform_indices = @transform_1, window_bounds = array<i64: 128, 128>}, {pipeline_mode = #tpu.pipeline_mode<synchronous>, transform_indices = @transform_2, window_bounds = array<i64: 1, 128>}, {transform_indices = @transform_3, window_bounds = array<i64: 16, 128>}, {transform_indices = @transform_4, window_bounds = array<i64: 1, 1, 128>}, {transform_indices = @transform_5, window_bounds = array<i64: 1, 1, 128>}]} {
    %c0_i32 = arith.constant 0 : i32
    %0 = arith.cmpi eq, %arg1, %c0_i32 : i32
    %1 = arith.extui %0 : i1 to i32
    %c0_i32_0 = arith.constant 0 : i32
    %2 = arith.cmpi ne, %1, %c0_i32_0 : i32
    scf.if %2 {
      %cst_22 = arith.constant 0.000000e+00 : f32
      %28 = vector.broadcast %cst_22 : f32 to vector<1x128xf32>
      %c0_23 = arith.constant 0 : index
      %c0_24 = arith.constant 0 : index
      %c0_25 = arith.constant 0 : index
      %29 = vector.load %arg6[%c0_23, %c0_24, %c0_25] : memref<1x1x128xf32, #tpu.memory_space<vmem>>, vector<1x1x128xf32>
      %30 = vector.shape_cast %29 : vector<1x1x128xf32> to vector<1x128xf32>
      %31 = vector.shape_cast %28 : vector<1x128xf32> to vector<1x1x128xf32>
      tpu.vector_store %arg6[%c0_23, %c0_24, %c0_25], %31 {strides = array<i32>} : memref<1x1x128xf32, #tpu.memory_space<vmem>>, vector<1x1x128xf32>,
      %cst_26 = arith.constant 0.000000e+00 : f32
      %32 = vector.broadcast %cst_26 : f32 to vector<1x128xf32>
      %c0_27 = arith.constant 0 : index
      %c0_28 = arith.constant 0 : index
      %c0_29 = arith.constant 0 : index
      %33 = vector.load %arg7[%c0_27, %c0_28, %c0_29] : memref<1x1x128xf32, #tpu.memory_space<vmem>>, vector<1x1x128xf32>
      %34 = vector.shape_cast %33 : vector<1x1x128xf32> to vector<1x128xf32>
      %35 = vector.shape_cast %32 : vector<1x128xf32> to vector<1x1x128xf32>
      tpu.vector_store %arg7[%c0_27, %c0_28, %c0_29], %35 {strides = array<i32>} : memref<1x1x128xf32, #tpu.memory_space<vmem>>, vector<1x1x128xf32>,
    } else {
    }
    %c0 = arith.constant 0 : index
    %c0_1 = arith.constant 0 : index
    %3 = vector.load %arg2[%c0, %c0_1] : memref<16x128xf32, #tpu.memory_space<vmem>>, vector<16x128xf32>
    %4 = arith.truncf %3 : vector<16x128xf32> to vector<16x128xbf16>
    %c0_2 = arith.constant 0 : index
    %c0_3 = arith.constant 0 : index
    %5 = vector.load %arg3[%c0_2, %c0_3] : memref<128x128xbf16, #tpu.memory_space<vmem>>, vector<128x128xbf16>
    %cst = arith.constant dense<0.000000e+00> : vector<16x128xf32>
    %6 = tpu.matmul %4, %5, %cst {dimension_numbers = #tpu.dot_dimension_numbers<[1], [0], [0], [1], [0, 0, 1, 1], [], []>} : vector<16x128xbf16>, vector<128x128xbf16>, vector<16x128xf32> -> vector<16x128xf32>
    %c0_4 = arith.constant 0 : index
    %c0_5 = arith.constant 0 : index
    %7 = vector.load %arg4[%c0_4, %c0_5] : memref<1x128xf32, #tpu.memory_space<vmem>>, vector<1x128xf32>
    %8 = vector.broadcast %7 : vector<1x128xf32> to vector<16x128xf32>
    %9 = arith.addf %6, %8 : vector<16x128xf32>
    %c0_6 = arith.constant 0 : index
    %c0_7 = arith.constant 0 : index
    %10 = vector.load %arg5[%c0_6, %c0_7] : memref<16x128xf32, #tpu.memory_space<vmem>>, vector<16x128xf32>
    tpu.vector_store %arg5[%c0_6, %c0_7], %9 {strides = array<i32>} : memref<16x128xf32, #tpu.memory_space<vmem>>, vector<16x128xf32>,
    %c0_8 = arith.constant 0 : index
    %c0_9 = arith.constant 0 : index
    %c0_10 = arith.constant 0 : index
    %11 = vector.load %arg6[%c0_8, %c0_9, %c0_10] : memref<1x1x128xf32, #tpu.memory_space<vmem>>, vector<1x1x128xf32>
    %12 = vector.shape_cast %11 : vector<1x1x128xf32> to vector<1x128xf32>
    %cst_11 = arith.constant dense<0.000000e+00> : vector<128xf32>
    %13 = vector.multi_reduction <add>, %9, %cst_11 [0] : vector<16x128xf32> to vector<128xf32>
    %14 = vector.shape_cast %13 : vector<128xf32> to vector<1x128xf32>
    %15 = arith.addf %12, %14 : vector<1x128xf32>
    %c0_12 = arith.constant 0 : index
    %c0_13 = arith.constant 0 : index
    %c0_14 = arith.constant 0 : index
    %16 = vector.load %arg6[%c0_12, %c0_13, %c0_14] : memref<1x1x128xf32, #tpu.memory_space<vmem>>, vector<1x1x128xf32>
    %17 = vector.shape_cast %16 : vector<1x1x128xf32> to vector<1x128xf32>
    %18 = vector.shape_cast %15 : vector<1x128xf32> to vector<1x1x128xf32>
    tpu.vector_store %arg6[%c0_12, %c0_13, %c0_14], %18 {strides = array<i32>} : memref<1x1x128xf32, #tpu.memory_space<vmem>>, vector<1x1x128xf32>,
    %c0_15 = arith.constant 0 : index
    %c0_16 = arith.constant 0 : index
    %c0_17 = arith.constant 0 : index
    %19 = vector.load %arg7[%c0_15, %c0_16, %c0_17] : memref<1x1x128xf32, #tpu.memory_space<vmem>>, vector<1x1x128xf32>
    %20 = vector.shape_cast %19 : vector<1x1x128xf32> to vector<1x128xf32>
    %21 = arith.mulf %9, %9 : vector<16x128xf32>
    %cst_18 = arith.constant dense<0.000000e+00> : vector<128xf32>
    %22 = vector.multi_reduction <add>, %21, %cst_18 [0] : vector<16x128xf32> to vector<128xf32>
    %23 = vector.shape_cast %22 : vector<128xf32> to vector<1x128xf32>
    %24 = arith.addf %20, %23 : vector<1x128xf32>
    %c0_19 = arith.constant 0 : index
    %c0_20 = arith.constant 0 : index
    %c0_21 = arith.constant 0 : index
    %25 = vector.load %arg7[%c0_19, %c0_20, %c0_21] : memref<1x1x128xf32, #tpu.memory_space<vmem>>, vector<1x1x128xf32>
    %26 = vector.shape_cast %25 : vector<1x1x128xf32> to vector<1x128xf32>
    %27 = vector.shape_cast %24 : vector<1x128xf32> to vector<1x1x128xf32>
    tpu.vector_store %arg7[%c0_19, %c0_20, %c0_21], %27 {strides = array<i32>} : memref<1x1x128xf32, #tpu.memory_space<vmem>>, vector<1x1x128xf32>,
    return
  }
  func.func @transform_0(%arg0: i32, %arg1: i32) -> (i32, i32) {
    %c1_i32 = arith.constant 1 : i32
    %0 = arith.muli %arg0, %c1_i32 : i32
    %1 = arith.addi %0, %arg1 : i32
    %c0_i32 = arith.constant 0 : i32
    %c0_i32_0 = arith.constant 0 : i32
    return %1, %c0_i32 : i32, i32
  }
  func.func @transform_1(%arg0: i32, %arg1: i32) -> (i32, i32) {
    %c0_i32 = arith.constant 0 : i32
    %c0_i32_0 = arith.constant 0 : i32
    %c0_i32_1 = arith.constant 0 : i32
    return %c0_i32, %c0_i32_0 : i32, i32
  }
  func.func @transform_2(%arg0: i32, %arg1: i32) -> (i32, i32) {
    %c0_i32 = arith.constant 0 : i32
    %c0_i32_0 = arith.constant 0 : i32
    %c0_i32_1 = arith.constant 0 : i32
    return %c0_i32, %c0_i32_0 : i32, i32
  }
  func.func @transform_3(%arg0: i32, %arg1: i32) -> (i32, i32) {
    %c1_i32 = arith.constant 1 : i32
    %0 = arith.muli %arg0, %c1_i32 : i32
    %1 = arith.addi %0, %arg1 : i32
    %c0_i32 = arith.constant 0 : i32
    %c0_i32_0 = arith.constant 0 : i32
    return %1, %c0_i32 : i32, i32
  }
  func.func @transform_4(%arg0: i32, %arg1: i32) -> (i32, i32, i32) {
    %c0_i32 = arith.constant 0 : i32
    %c0_i32_0 = arith.constant 0 : i32
    %c0_i32_1 = arith.constant 0 : i32
    return %arg0, %c0_i32, %c0_i32_0 : i32, i32, i32
  }
  func.func @transform_5(%arg0: i32, %arg1: i32) -> (i32, i32, i32) {
    %c0_i32 = arith.constant 0 : i32
    %c0_i32_0 = arith.constant 0 : i32
    %c0_i32_1 = arith.constant 0 : i32
    return %arg0, %c0_i32, %c0_i32_0 : i32, i32, i32
  }
}

</mosaic_0001>

<bundles_post_ra>
// kernel: tpu_custom_call.1
= control target key start
LH: loop header
LB: loop body
LE: loop exit
PB: predicated region body
PF: predicated region fallthrough
CT: control target
= control target key end

     0   :  { %s1219_s0 = inlined_call_operand.hbm [shape: f32[32,128], index: 0, kind: input, shape index: {}]   ;;  %s1220_s1 = inlined_call_operand.hbm [shape: bf16[128,128], index: 1, kind: input, shape index: {}]   ;;  %s1221_s2 = inlined_call_operand.vmem [shape: f32[1,128], index: 2, kind: input, shape index: {}]   ;;  %s1222_s3 = inlined_call_operand.hbm [shape: f32[32,128], index: 3, kind: output, shape index: {0}]   ;;  %s1223_s4 = inlined_call_operand.hbm [shape: f32[2,1,128], index: 4, kind: output, shape index: {1}]   ;;  %s1224_s5 = inlined_call_operand.hbm [shape: f32[2,1,128], index: 5, kind: output, shape index: {2}]  }
   0x1   :  { %1229 = sst [smem:[#allocation17_spill]] %s1220_s1 }
   0x2   :  { %11 = vsyncpa [#allocation3], 0 }
   0x3   :  { %13 = vsyncpa [#allocation3 + $0x1], 0 }
   0x4   :  { %14 = vsyncpa [#allocation6], 0 }
   0x5   :  { %15 = vsyncpa [#allocation4], 0 }
   0x6   :  { %17 = vsyncpa [#allocation4 + $0x1], 0 }
   0x7   :  { %18 = vsyncpa [#allocation9], 0 }
   0x8   :  { %20 = vsyncpa [#allocation9 + $0x1], 0  ;;  %s1007_s18 = smov 0   ;;  %s1009_s19 = smov 0  }
   0x9   :  { %s1011_s20 = smov 0   ;;  %s1013_s21 = smov 0  }
   0xa   :  { %s1015_s22 = smov 0   ;;  %s1017_s23 = smov 0  }
   0xb LB: > { %1230 = sst [smem:[#allocation15_spill]] %s967_s23  ;;  %s1038_s24 = sadd.s32 4294967295, %s967_s23   ;;  %s967_s23 = sphi %s1017_s23, %s26_s23   ;;  %s963_s22 = sphi %s1015_s22, %s1245_s22   ;;  %s959_s21 = sphi %s1013_s21, %s1244_s21   ;;  %s955_s20 = sphi %s1011_s20, %s1243_s20   ;;  %s951_s19 = sphi %s1009_s19, %s1242_s19   ;;  %s947_s18 = sphi %s1007_s18, %s1241_s18  }
   0xc   : > { %s1225_s25 = sadd.s32 4294967294, %s967_s23   ;;  %p60_p0 = scmp.ne.s32.totalorder %s951_s19, %s947_s18 }
   0xd   : > { %p61_p1 = scmp.eq.s32.totalorder %s1038_s24, 0  ;;  %p128_p2 = scmp.eq.s32.totalorder %s1038_s24, 1 }
   0xe   : > { %p134_p3 = scmp.eq.s32.totalorder %s1225_s25, 1  ;;  %p613_p5 = scmp.ge.s32.totalorder %s967_s23, 1 }
   0xf   : > { %p1049_p4 = por %p61_p1, %p60_p0  ;;  %p193_p7 = scmp.lt.s32.totalorder %s967_s23, 3 }
  0x10   : > { %p1054_p6 = por %p134_p3, %p60_p0  ;;  %s1233_s1 = sld [smem:[#allocation17_spill]] }
  0x11   : > { %p1062_p8 = pnand %p613_p5, %p193_p7  ;;  %s969_s7 = smov [#allocation5]  }
  0x12   : > { %s206_s8 = sshll.u32 %s969_s7, 4  ;;  %p615_p11 = scmp.ge.s32.totalorder %s967_s23, 2  ;;  %s207_s8 = int_to_ptr.vmem [resolvable:$true] %s206_s8 }
  0x13   : > { %p682_p9 = pneg %p1062_p8  ;;  %s970_s9 = smov 64  }
  0x14   : > { %s971_s10 = smov 4   ;;  %s38_s11 = sadd.s32 1, %s963_s22 }
  0x15   : > { %p683_p10 = pnand %p682_p9, %p61_p1  ;;  %p40_p12 = scmp.ge.s32.totalorder %s38_s11, 2 }
  0x16   : > { %s204_s30 = sshll.u32 %s1233_s1, 4  ;;  %s47_s12 = sadd.s32 1, %s955_s20  ;;  %s205_s30 = int_to_ptr.hbm [resolvable:$true] %s204_s30 }
  0x17   : > { %685 = dma.hbm_to_vmem [thread:$0]  (!%p683_p10), %s205_s30, 1024, %s207_s8, [#allocation6], %s970_s9, %s970_s9, %s971_s10  }
  0x18   : > { %p54_p13 = scmp.ne.s32.totalorder %s955_s20, %s951_s19  ;;  %p55_p0 = scmp.eq.s32.totalorder %s967_s23, 0 }
  0x19   : > { %s1247_s11 = smov (%p40_p12, %s38_s11), 0  ;;  %p701_p7 = scmp.lt.s32.totalorder %s967_s23, 2 }
  0x1a   : > { %1235 = sst [smem:[#allocation16_spill]] %s1247_s11  ;;  %p1078_p3 = por %p55_p0, %p54_p13 }
  0x1b   : > { %p1084_p5 = por %p128_p2, %p54_p13  ;;  %s44_s15 = ssub.s32 %s963_s22, %s1247_s11 }
  0x1c   : > { %p45_p9 = scmp.eq.s32.totalorder %s44_s15, 0  ;;  %s223_s16 = sand.u32 1, %s955_s20  }
  0x1d   : > { %s616_s17 = sshll.u32 %s223_s16, 4  ;;  %s660_s29 = sshll.u32 %s963_s22, 4 }
  0x1e   : > { %s1093_s28 = scalar_select %p45_p9, %s955_s20, %s47_s12  }
  0x1f   : > { %s233_s8 = scalar_lea.hbm %s1219_s0, %s660_s29  ;;  %s227_s9 = scalar_lea.vmem [#allocation2], %s616_s17 }
  0x20   : > { %s236_s10 = sshll.u32 %s227_s9, 4  ;;  %s234_s25 = sshll.u32 %s233_s8, 4  ;;  %s237_s10 = int_to_ptr.vmem [resolvable:$true] %s236_s10  ;;  %s235_s25 = int_to_ptr.hbm [resolvable:$true] %s234_s25 }
  0x21   : > { %p687_p2 = pnand %p701_p7, %p1078_p3  ;;  %s224_s1 = scalar_lea.sflag [#allocation3], %s223_s16 }
  0x22   : > { %s972_s11 = smov 128   ;;  %s973_s23 = smov 8  }
  0x23   : > { %689 = dma.hbm_to_vmem [thread:$0]  (!%p687_p2), %s235_s25, 256, %s237_s10, %s224_s1, %s972_s11, %s972_s11, %s973_s23  }
  0x24   : > { %248 = sbr.rel (%p1062_p8) target bundleno = 244 (0xf4), region = 32  ;;  %s1104_s12 = sand.u32 (!%p1062_p8), 1, %s951_s19  }
  0x25   : > { %s620_s15 = sshll.u32 (!%p1062_p8), %s1104_s12, 4  ;;  %s251_s17 = scalar_lea.sflag (!%p1062_p8), [#allocation3], %s1104_s12 }
  0x26   : > { %s254_s29 = scalar_lea.vmem (!%p1062_p8), [#allocation2], %s620_s15 }
  0x29   : > { %930 = dma.done.wait (%p1049_p4), %s251_s17, 256  }
  0x2a   : > { %932 = vsyncadd (%p1049_p4), %s251_s17, 4294967040 }
  0x2b   : > { %934 = dma.done.wait (%p61_p1), [#allocation6], 1024  }
  0x2c   : > { %936 = vsyncadd (%p61_p1), [#allocation6], 4294966272  ;;  %v668_v0 = vld [vmem:[#allocation5 + $0x38] sm:$0xff]  ;;  %v667_v1 = vld [vmem:[#allocation5 + $0x30] sm:$0xff]  ;;  %s1119_s1 = scalar_lea.vmem [#allocation8], %s1104_s12  ;;  %v974_v11 = vmov 0.0  }
  0x2d   : > { %376 = vmatpush.bf16.msra.mxu0 %v668_v0  ;;  %v666_v2 = vld [vmem:[#allocation5 + $0x28] sm:$0xff]  ;;  %v665_v3 = vld [vmem:[#allocation5 + $0x20] sm:$0xff]  ;;  %v664_v4 = vld [vmem:[#allocation5 + $0x18] sm:$0xff]  ;;  %303 = vst [vmem:[%s1119_s1] sm:$0x1] %v974_v11  ;;  %s1123_s23 = scalar_lea.vmem [#allocation10], %s1104_s12  ;;  %s669_s6 = sshll.u32 %s959_s21, 4 }
  0x2e   : > { %v663_v5 = vld [vmem:[#allocation5 + $0x10] sm:$0xff]  ;;  %v662_v6 = vld [vmem:[#allocation5 + $0x8] sm:$0xff]  ;;  %v661_v7 = vld [vmem:[#allocation5] sm:$0xff]  ;;  %304 = vst [vmem:[%s1123_s23] sm:$0x1] %v974_v11  ;;  %s282_s11 = scalar_lea.vmem [#allocation7], %s620_s15  ;;  %s435_s30 = scalar_lea.hbm %s1222_s3, %s669_s6 }
  0x2f   : > { %v305_v8 = vld [vmem:[%s254_s29] sm:$0xff]  ;;  %v306_v9 = vld [vmem:[%s254_s29 + $0x8] sm:$0xff]  ;;  %s436_s7 = sshll.u32 %s282_s11, 4  ;;  %s438_s8 = sshll.u32 %s435_s30, 4  ;;  %s437_s7 = int_to_ptr.vmem [resolvable:$true] %s436_s7  ;;  %s439_s8 = int_to_ptr.hbm [resolvable:$true] %s438_s8 }
  0x30   : > { %v307_v10 = vpack.c.bf16 %v306_v9, %v305_v8  ;;  %v760_v12 = vld [vmem:[%s1221_s2] ss:$0 sm:$0xff]  ;;  %s415_s9 = scalar_lea.sflag [#allocation4], %s1104_s12  ;;  %s835_s10 = sshra.s32 %s439_s8, 4  ;;  %s836_s10 = int_to_ptr.hbm [resolvable:$true] %s835_s10 }
  0x31   : > { %377 = vmatpush.bf16.msra.mxu0 %v667_v1  ;;  %s837_s15 = scalar_lea.hbm %s836_s10, 16  ;;  %s841_s25 = scalar_lea.hbm %s1222_s3, 32 }
  0x32   : > { %p838_p1 = scmp.ne.s32.totalorder %s836_s10, %s837_s15  ;;  %p842_p10 = scmp.lt.s32.totalorder %s836_s10, %s1222_s3 }
  0x33   : > { %p843_p12 = scmp.lt.s32.totalorder %s841_s25, %s837_s15 }
  0x34   : > { %p839_p4 = pnand %p838_p1, %p1084_p5 }
  0x35   : > { %378 = vmatpush.bf16.msra.mxu0 %v666_v2  ;;  %p844_p13 = por %p843_p12, %p842_p10 }
  0x36   : > { %p840_p8 = pneg %p839_p4 }
  0x38   : > { %p845_p0 = pnand %p844_p13, %p840_p8 }
  0x39   : > { %379 = vmatpush.bf16.msra.mxu0 %v665_v3 }
  0x3d   : > { %380 = vmatpush.bf16.msra.mxu0 %v664_v4 }
  0x41   : > { %381 = vmatpush.bf16.msra.mxu0 %v663_v5 }
  0x45   : > { %382 = vmatpush.bf16.msra.mxu0 %v662_v6 }
  0x49   : > { %383 = vmatpush.bf16.msra.mxu0 %v661_v7 }
  0x4c   : > { %384 = vmatmul.bf16.vlgmr.msra.gmra.mxu0 %v307_v10 }
  0xc9   : > { %v385_v13 = vpop.f32.mrf.mxu0 }
  0xca   : > { %v386_v14 = vadd.f32 %v760_v12, %v385_v13 }
  0xcc   : > { %390 = vst [vmem:[%s282_s11] sm:$0xff] %v386_v14  ;;  %v403_v17 = vmul.f32 %v386_v14, %v386_v14 }
  0xd1   : > { %v387_v15 = vpop.f32.mrf.mxu0 }
  0xd2   : > { %v388_v16 = vadd.f32 %v760_v12, %v387_v15 }
  0xd4   : > { %391 = vst [vmem:[%s282_s11 + $0x8] sm:$0xff] %v388_v16  ;;  %v393_v18 = vadd.f32 %v388_v16, %v386_v14  ;;  %v404_v19 = vmul.f32 %v388_v16, %v388_v16 }
  0xd5   : > { %848 = shalt.err (!%p845_p0)
}
  0xd6   : > { %s975_s12 = smov 128   ;;  %s976_s11 = smov 8   ;;  %v394_v20 = vrot.slane %v393_v18, 4  ;;  %v405_v21 = vadd.f32 %v404_v19, %v403_v17  ;;  %v392_v30 = vld [vmem:[%s1119_s1] sm:$0x1] }
  0xd7   : > { %676 = dma.vmem_to_hbm [thread:$0]  (%p1084_p5), %s437_s7, 256, %s439_s8, %s415_s9, %s975_s12, %s975_s12, %s976_s11  }
  0xd8   : > { %v395_v22 = vadd.f32 %v394_v20, %v393_v18  ;;  %v406_v23 = vrot.slane %v405_v21, 4  ;;  %s450_s30 = scalar_lea.hbm %s1223_s4, %s959_s21  ;;  %s419_s10 = sand.u32 1, %s1038_s24   ;;  %v402_v33 = vld [vmem:[%s1123_s23] sm:$0x1] }
  0xd9   : > { %s463_s8 = scalar_lea.hbm %s1224_s5, %s959_s21  ;;  %s452_s9 = sshll.u32 %s1119_s1, 4  ;;  %s453_s9 = int_to_ptr.vmem [resolvable:$true] %s452_s9 }
  0xda   : > { %v396_v24 = vrot.slane %v395_v22, 2  ;;  %v407_v25 = vadd.f32 %v406_v23, %v405_v21  ;;  %s1157_s17 = sshll.u32 %s450_s30, 4  ;;  %s465_s29 = sshll.u32 %s1123_s23, 4  ;;  %s455_s17 = int_to_ptr.hbm [resolvable:$true] %s1157_s17  ;;  %s1165_s29 = int_to_ptr.vmem [resolvable:$true] %s465_s29 }
  0xdb   : > { %s1161_s25 = sshll.u32 %s463_s8, 4  ;;  %s420_s21 = scalar_lea.sflag [#allocation9], %s419_s10  ;;  %s468_s25 = int_to_ptr.hbm [resolvable:$true] %s1161_s25 }
  0xdc   : > { %v397_v26 = vadd.f32 %v396_v24, %v395_v22  ;;  %v408_v27 = vrot.slane %v407_v25, 2  ;;  %s863_s24 = sshra.s32 %s455_s17, 4  ;;  %s869_s11 = scalar_lea.hbm %s1223_s4, 2  ;;  %s864_s24 = int_to_ptr.hbm [resolvable:$true] %s863_s24 }
  0xdd   : > { %s865_s26 = scalar_lea.hbm %s864_s24, 1  ;;  %p870_p2 = scmp.lt.s32.totalorder %s864_s24, %s1223_s4 }
  0xde   : > { %v398_v28 = vrot.slane %v397_v26, 1  ;;  %v409_v29 = vadd.f32 %v408_v27, %v407_v25  ;;  %p866_p3 = scmp.ne.s32.totalorder %s864_s24, %s865_s26  ;;  %p871_p1 = scmp.lt.s32.totalorder %s869_s11, %s865_s26 }
  0xe0   : > { %v399_v31 = vadd.f32 %v398_v28, %v397_v26  ;;  %v410_v32 = vrot.slane %v409_v29, 1  ;;  %p867_p7 = pnand %p866_p3, %p1084_p5  ;;  %p872_p4 = por %p871_p1, %p870_p2 }
  0xe2   : > { %v411_v34 = vadd.f32 %v410_v32, %v409_v29  ;;  %v400_v35 = vadd.f32 %v399_v31, %v392_v30  ;;  %p868_p9 = pneg %p867_p7 }
  0xe4   : > { %401 = vst [vmem:[%s1119_s1] sm:$0x1] %v400_v35  ;;  %v412_v36 = vadd.f32 %v411_v34, %v402_v33  ;;  %p873_p8 = pnand %p872_p4, %p868_p9 }
  0xe6   : > { %876 = shalt.err (!%p873_p8)
}
  0xe7   : > { %677 = dma.vmem_to_hbm [thread:$0]  (%p1084_p5), %s453_s9, 16, %s455_s17, %s420_s21   ;;  %413 = vst [vmem:[%s1123_s23] sm:$0x1] %v412_v36 }
  0xe8   : > { %s891_s1 = sshra.s32 %s468_s25, 4  ;;  %s897_s7 = scalar_lea.hbm %s1224_s5, 2  ;;  %s892_s1 = int_to_ptr.hbm [resolvable:$true] %s891_s1 }
  0xe9   : > { %s893_s30 = scalar_lea.hbm %s892_s1, 1  ;;  %p898_p0 = scmp.lt.s32.totalorder %s892_s1, %s1224_s5 }
  0xea   : > { %p894_p10 = scmp.ne.s32.totalorder %s892_s1, %s893_s30  ;;  %p899_p3 = scmp.lt.s32.totalorder %s897_s7, %s893_s30 }
  0xec   : > { %p895_p12 = pnand %p894_p10, %p1084_p5  ;;  %p900_p7 = por %p899_p3, %p898_p0 }
  0xee   : > { %p896_p13 = pneg %p895_p12 }
  0xf0   : > { %p901_p9 = pnand %p900_p7, %p896_p13 }
  0xf2   : > { %904 = shalt.err (!%p901_p9)
}
  0xf3   : > { %678 = dma.vmem_to_hbm [thread:$0]  (%p1084_p5), %s1165_s29, 16, %s468_s25, %s420_s21  }
  0xf4 PF: > { %s1238_s23 = sld [smem:[#allocation15_spill]]  ;;  %s479_s9 = sand.u32 1, %s947_s18  }
  0xf5   : > { %p691_p2 = pnand %p615_p11, %p1054_p6  ;;  %s480_s17 = scalar_lea.sflag [#allocation4], %s479_s9 }
  0xf7   : > { %p692_p1 = pneg %p691_p2 }
  0xf9   : > { %938 = dma.done.wait (%p692_p1), %s480_s17, 256  }
  0xfa   : > { %940 = vsyncadd (%p692_p1), %s480_s17, 4294967040  ;;  %s1239_s26 = sadd.s32 4294967294, %s1238_s23  }
  0xfb   : > { %s489_s6 = sand.u32 1, %s1239_s26  }
  0xfc   : > { %s490_s14 = scalar_lea.sflag [#allocation9], %s489_s6 }
  0xfd   : > { %942 = dma.done.wait (%p692_p1), %s490_s14, 32  }
  0xfe   : > { %944 = vsyncadd (%p692_p1), %s490_s14, 4294967264  ;;  %s26_s23 = sadd.s32 1, %s1238_s23   ;;  %s1240_s27 = sld [smem:[#allocation16_spill]] }
  0xff   : > { %p23_p5 = scmp.ge.s32.totalorder %s26_s23, 4   ;;  %s1241_s18 = smov %s951_s19 }
 0x100   : > { %s1242_s19 = smov %s955_s20  ;;  %s1243_s20 = smov %s1093_s28 }
 0x101   : > { %s1244_s21 = smov %s963_s22  ;;  %25 = sbr.rel (!%p23_p5) target bundleno = 11 (0xb), region = 117 }
 0x104   : > { %s1245_s22 = smov %s1240_s27 }
 0x106   :  { %504 = vsyncpa [#allocation3], 1 }
 0x107   :  { %506 = vsyncpa [#allocation3 + $0x1], 1 }
 0x108   :  { %507 = vsyncpa [#allocation6], 1 }
 0x109   :  { %508 = vsyncpa [#allocation4], 1 }
 0x10a   :  { %510 = vsyncpa [#allocation4 + $0x1], 1 }
 0x10b   :  { %511 = vsyncpa [#allocation9], 1 }
 0x10c   :  { %513 = vsyncpa [#allocation9 + $0x1], 1 }

</bundles_post_ra>
